<compile_context>
chip_gen: v6e
topology: v6e:2x2x1
jax: 0.10.0
libtpu: 0.0.40
codegen_flags: <defaults>
</compile_context>

<pallas_src>
import functools

import jax
import jax.numpy as jnp
import numpy as np
from jax.experimental import pallas as pl
from jax.experimental.pallas import tpu as pltpu

_LN2 = 0.6931471805599453


def _row_shift(x, dh):
    """y[h, :] = x[h + dh, :]; zero rows shifted in at the H edges (conv pad)."""
    if dh == 0:
        return x
    _, cw = x.shape
    zero_row = jnp.zeros((1, cw), x.dtype)
    if dh == 1:
        return jnp.concatenate([x[1:, :], zero_row], axis=0)
    return jnp.concatenate([zero_row, x[:-1, :]], axis=0)


def _col_shift(x, dw):
    """y[:, l] = x[:, l + dw]; zero cols at the slab edges.  Lanes that would
    read across a channel band are zeroed by the caller's wpos mask."""
    if dw == 0:
        return x
    h, _ = x.shape
    zero_col = jnp.zeros((h, 1), x.dtype)
    if dw == 1:
        return jnp.concatenate([x[:, 1:], zero_col], axis=1)
    return jnp.concatenate([zero_col, x[:, :-1]], axis=1)


def _fused_sharpen_kernel(filt_ref, x_ref, out_ref, *, W):
    # filt_ref: SMEM (n_mults, 9) clamped filters (scalar prefetch).
    # x_ref / out_ref: VMEM (H, C*W) fp32 slab, channel bands along lanes.
    m = pl.program_id(0)
    x = x_ref[...]
    H, CW = x.shape

    # Lane position inside its channel band: emulates the conv's zero padding
    # in W so W-direction taps never read the neighbouring channel's band.
    wpos = jax.lax.broadcasted_iota(jnp.int32, (H, CW), 1) % W
    ok_from_right = wpos < (W - 1)   # dw = +1 reads w+1
    ok_from_left = wpos >= 1         # dw = -1 reads w-1

    # Statically unrolled 9-tap accumulation over the whole (H, C*W) slab.
    acc = jnp.zeros((H, CW), jnp.float32)
    for dh in (-1, 0, 1):
        xs = _row_shift(x, dh)
        for dw in (-1, 0, 1):
            tap = filt_ref[m, (dh + 1) * 3 + (dw + 1)]
            s = _col_shift(xs, dw)
            if dw == 1:
                s = jnp.where(ok_from_right, s, 0.0)
            elif dw == -1:
                s = jnp.where(ok_from_left, s, 0.0)
            acc = acc + tap * s

    # approx_division: out = x + result / 2**round(log2(max(result)/128)),
    # identity division when the divisor is <= 0.  Done on a (1,1) value so the
    # transcendentals stay on the EUP path and are negligible.
    rmax = jnp.max(acc, keepdims=True)                     # (1, 1)
    div = rmax * (1.0 / 128.0)
    pos = div > 0.0
    safe = jnp.where(pos, div, 1.0)
    shift_exp = jnp.round(jnp.log(safe) * (1.0 / _LN2))    # round(log2(div))
    inv = jnp.where(pos, jnp.exp(-shift_exp * _LN2), 1.0)  # 2**(-round(log2(div)))
    out_ref[...] = x + acc * inv


def forward_model_forward(x_nchw, weight, weight_factor, n_mults, image_size=32):
    """Pallas port of Forward_Model.forward(input, acc=False, mults=None,
    use_saved_divisor2=False).  Returns (n_mults, 1, C, image_size, image_size)."""
    N, C, H, W = x_nchw.shape
    assert N == 1 and H == image_size and W == image_size

    # clamp + hardtanh in the torch code net out to simple clips.
    w_clamped = jnp.clip(weight[:n_mults], -1.0, 1.0)            # (n, 9)
    wf_clamped = jnp.clip(weight_factor[:n_mults], 1.0, 255.0)   # (n, 1)
    # TODO(synk): mul_wrapper's approximate multiplier (mul_approx_index) has no
    # Pallas equivalent; exact float multiplication is used instead.
    filt = (w_clamped * wf_clamped).astype(jnp.float32)          # (n, 9)

    # Lane-dense slab: (H, C*W), channel bands along the lane axis.
    x = x_nchw[0].astype(jnp.float32)                            # (C, H, W)
    x_slab = jnp.transpose(x, (1, 0, 2)).reshape(H, C * W)       # (H, C*W)

    out_slab = pl.pallas_call(
        functools.partial(_fused_sharpen_kernel, W=W),
        out_shape=jax.ShapeDtypeStruct((n_mults, H, C * W), jnp.float32),
        grid_spec=pltpu.PrefetchScalarGridSpec(
            num_scalar_prefetch=1,            # filt -> SMEM, passed first to kernel
            grid=(n_mults,),
            in_specs=[
                # image: one full-array VMEM block, resident across all mults
                pl.BlockSpec((H, C * W), lambda m, filt: (0, 0)),
            ],
            out_specs=pl.BlockSpec((None, H, C * W), lambda m, filt: (m, 0, 0)),
        ),
        compiler_params=pltpu.CompilerParams(dimension_semantics=("parallel",)),
    )(filt, x_slab)

    # (n, H, C*W) -> (n, C, H, W) -> (n, 1, C, H, W)
    out = out_slab.reshape(n_mults, H, C, W).transpose(0, 2, 1, 3)
    return out[:, None, ...]
    # TODO(synk): the `mults` subset selection and saved_divisor2 save/reuse are
    # host-side bookkeeping in the torch module and are not reproduced here.


def init_params(n_mults):
    """Deterministic init matching Forward_Model.__init__ (size of mult list)."""
    base = np.array([-1.0, -1.0, -1.0, -1.0, 8.0, -1.0, -1.0, -1.0, -1.0]) / 8.0
    weight = jnp.asarray(np.tile(base, (n_mults, 1)), jnp.float32)                    # (n, 9)
    weight_factor = jnp.asarray(np.tile(np.array([8.0]), (n_mults, 1)), jnp.float32)  # (n, 1)
    scale = jnp.asarray(np.tile(np.array([8.0]), (n_mults, 1)), jnp.float32)          # unused (non-acc path)
    return weight, weight_factor, scale


def _reference_forward(x_nchw, weight, weight_factor, n_mults):
    """Pure-JAX reference (lax depthwise conv) for correctness checking."""
    x = x_nchw.astype(jnp.float32)
    C = x.shape[1]
    outs = []
    for ii in range(n_mults):
        w3 = (jnp.clip(weight[ii], -1.0, 1.0) *
              jnp.clip(weight_factor[ii], 1.0, 255.0)).reshape(1, 1, 3, 3)
        rhs = jnp.tile(w3, (C, 1, 1, 1)).astype(jnp.float32)
        res = jax.lax.conv_general_dilated(
            x, rhs, window_strides=(1, 1), padding=((1, 1), (1, 1)),
            feature_group_count=C,
            dimension_numbers=("NCHW", "OIHW", "NCHW"))
        div = jnp.max(res) / 128.0
        safe = jnp.where(div > 0, div, 1.0)
        inv = jnp.where(div > 0, 2.0 ** (-jnp.round(jnp.log2(safe))), 1.0)
        outs.append((x + res * inv)[0])
    return jnp.stack(outs, axis=0)[:, None, ...]


if __name__ == "__main__":
    mult_list = [1, 3]               # two approximate-mult indices -> exercises the mult grid axis
    n_mults = len(mult_list)
    size = 4                         # "size" == number of input channels (small test)
    image_size = 32                  # module's fixed image size (C*W = 128 -> lane dense)
    weight, weight_factor, _scale = init_params(n_mults)

    key = jax.random.PRNGKey(0)
    k_x, k_w, k_f = jax.random.split(key, 3)
    # Perturb the per-mult parameters so the grid steps differ from each other.
    weight = weight + 0.05 * jax.random.normal(k_w, weight.shape, dtype=jnp.float32)
    weight_factor = weight_factor + jax.random.uniform(
        k_f, weight_factor.shape, dtype=jnp.float32, minval=0.0, maxval=4.0)

    x = jax.random.uniform(k_x, (1, size, image_size, image_size),
                           dtype=jnp.float32, minval=0.0, maxval=255.0)

    fwd = jax.jit(functools.partial(forward_model_forward,
                                    n_mults=n_mults, image_size=image_size))
    out = jax.block_until_ready(fwd(x, weight, weight_factor))
    assert out.shape == (n_mults, 1, size, image_size, image_size), out.shape

    ref = _reference_forward(x, weight, weight_factor, n_mults)
    np.testing.assert_allclose(np.asarray(out), np.asarray(ref), rtol=1e-5, atol=1e-3)

    print("KERNEL_OK")
</pallas_src>

<mosaic_0001>
module attributes {stable_mosaic.version = 11 : i64} {
  func.func @_fused_sharpen_kernel(%arg0: i32, %arg1: memref<2x9xf32, #tpu.memory_space<smem>>, %arg2: memref<32x128xf32, #tpu.memory_space<vmem>>, %arg3: memref<1x32x128xf32, #tpu.memory_space<vmem>>) attributes {dimension_semantics = [#tpu.dimension_semantics<parallel>], iteration_bounds = array<i64: 2>, scalar_prefetch = 1 : i64, scratch_operands = 0 : i64, tpu.core_type = #tpu.core_type<tc>, window_params = [{pipeline_mode = #tpu.pipeline_mode<synchronous>, transform_indices = @transform_0, window_bounds = array<i64: 32, 128>}, {transform_indices = @transform_1, window_bounds = array<i64: 1, 32, 128>}]} {
    %c0 = arith.constant 0 : index
    %c0_0 = arith.constant 0 : index
    %0 = vector.load %arg2[%c0, %c0_0] : memref<32x128xf32, #tpu.memory_space<vmem>>, vector<32x128xf32>
    %1 = tpu.iota {dimensions = array<i32: 1>} : vector<32x128xi32>
    %c32_i32 = arith.constant 32 : i32
    %c0_i32 = arith.constant 0 : i32
    %2 = arith.cmpi eq, %c32_i32, %c0_i32 : i32
    %c1_i32 = arith.constant 1 : i32
    %3 = arith.select %2, %c1_i32, %c32_i32 : i32
    %4 = vector.broadcast %3 : i32 to vector<32x128xi32>
    %5 = arith.remsi %1, %4 : vector<32x128xi32>
    %c0_i32_1 = arith.constant 0 : i32
    %6 = vector.broadcast %c0_i32_1 : i32 to vector<32x128xi32>
    %7 = arith.cmpi ne, %5, %6 : vector<32x128xi32>
    %c0_i32_2 = arith.constant 0 : i32
    %8 = vector.broadcast %c0_i32_2 : i32 to vector<32x128xi32>
    %9 = arith.cmpi slt, %5, %8 : vector<32x128xi32>
    %c0_i32_3 = arith.constant 0 : i32
    %10 = arith.cmpi slt, %3, %c0_i32_3 : i32
    %11 = vector.broadcast %10 : i1 to vector<32x128xi1>
    %12 = vector.broadcast %11 : vector<32x128xi1> to vector<32x128xi1>
    %13 = arith.xori %9, %12 : vector<32x128xi1>
    %14 = arith.andi %13, %7 : vector<32x128xi1>
    %15 = vector.broadcast %3 : i32 to vector<32x128xi32>
    %16 = arith.addi %5, %15 : vector<32x128xi32>
    %17 = arith.select %14, %16, %5 : vector<32x128xi1>, vector<32x128xi32>
    %c31_i32 = arith.constant 31 : i32
    %18 = vector.broadcast %c31_i32 : i32 to vector<32x128xi32>
    %19 = arith.cmpi slt, %17, %18 : vector<32x128xi32>
    %c1_i32_4 = arith.constant 1 : i32
    %20 = vector.broadcast %c1_i32_4 : i32 to vector<32x128xi32>
    %21 = arith.cmpi sge, %17, %20 : vector<32x128xi32>
    %cst = arith.constant 0.000000e+00 : f32
    %22 = vector.broadcast %cst : f32 to vector<32x128xf32>
    %cst_5 = arith.constant 0.000000e+00 : f32
    %23 = vector.broadcast %cst_5 : f32 to vector<1x128xf32>
    %24 = vector.extract_strided_slice %0 {offsets = [0, 0], sizes = [31, 128], strides = [1, 1]} : vector<32x128xf32> to vector<31x128xf32>
    %25 = tpu.concatenate %23, %24 in 0 : vector<1x128xf32>, vector<31x128xf32> -> vector<32x128xf32>
    %26 = arith.index_cast %arg0 : i32 to index
    %c0_6 = arith.constant 0 : index
    %27 = memref.load %arg1[%26, %c0_6] : memref<2x9xf32, #tpu.memory_space<smem>>
    %cst_7 = arith.constant 0.000000e+00 : f32
    %28 = vector.broadcast %cst_7 : f32 to vector<32x1xf32>
    %29 = vector.extract_strided_slice %25 {offsets = [0, 0], sizes = [32, 127], strides = [1, 1]} : vector<32x128xf32> to vector<32x127xf32>
    %30 = tpu.concatenate %28, %29 in 1 : vector<32x1xf32>, vector<32x127xf32> -> vector<32x128xf32>
    %cst_8 = arith.constant 0.000000e+00 : f32
    %31 = vector.broadcast %cst_8 : f32 to vector<32x128xf32>
    %32 = arith.select %21, %30, %31 : vector<32x128xi1>, vector<32x128xf32>
    %33 = vector.broadcast %27 : f32 to vector<32x128xf32>
    %34 = arith.mulf %33, %32 : vector<32x128xf32>
    %35 = arith.addf %22, %34 : vector<32x128xf32>
    %36 = arith.index_cast %arg0 : i32 to index
    %c1 = arith.constant 1 : index
    %37 = memref.load %arg1[%36, %c1] : memref<2x9xf32, #tpu.memory_space<smem>>
    %38 = vector.broadcast %37 : f32 to vector<32x128xf32>
    %39 = arith.mulf %38, %25 : vector<32x128xf32>
    %40 = arith.addf %35, %39 : vector<32x128xf32>
    %41 = arith.index_cast %arg0 : i32 to index
    %c2 = arith.constant 2 : index
    %42 = memref.load %arg1[%41, %c2] : memref<2x9xf32, #tpu.memory_space<smem>>
    %cst_9 = arith.constant 0.000000e+00 : f32
    %43 = vector.broadcast %cst_9 : f32 to vector<32x1xf32>
    %44 = vector.extract_strided_slice %25 {offsets = [0, 1], sizes = [32, 127], strides = [1, 1]} : vector<32x128xf32> to vector<32x127xf32>
    %45 = tpu.concatenate %44, %43 in 1 : vector<32x127xf32>, vector<32x1xf32> -> vector<32x128xf32>
    %cst_10 = arith.constant 0.000000e+00 : f32
    %46 = vector.broadcast %cst_10 : f32 to vector<32x128xf32>
    %47 = arith.select %19, %45, %46 : vector<32x128xi1>, vector<32x128xf32>
    %48 = vector.broadcast %42 : f32 to vector<32x128xf32>
    %49 = arith.mulf %48, %47 : vector<32x128xf32>
    %50 = arith.addf %40, %49 : vector<32x128xf32>
    %51 = arith.index_cast %arg0 : i32 to index
    %c3 = arith.constant 3 : index
    %52 = memref.load %arg1[%51, %c3] : memref<2x9xf32, #tpu.memory_space<smem>>
    %cst_11 = arith.constant 0.000000e+00 : f32
    %53 = vector.broadcast %cst_11 : f32 to vector<32x1xf32>
    %54 = vector.extract_strided_slice %0 {offsets = [0, 0], sizes = [32, 127], strides = [1, 1]} : vector<32x128xf32> to vector<32x127xf32>
    %55 = tpu.concatenate %53, %54 in 1 : vector<32x1xf32>, vector<32x127xf32> -> vector<32x128xf32>
    %cst_12 = arith.constant 0.000000e+00 : f32
    %56 = vector.broadcast %cst_12 : f32 to vector<32x128xf32>
    %57 = arith.select %21, %55, %56 : vector<32x128xi1>, vector<32x128xf32>
    %58 = vector.broadcast %52 : f32 to vector<32x128xf32>
    %59 = arith.mulf %58, %57 : vector<32x128xf32>
    %60 = arith.addf %50, %59 : vector<32x128xf32>
    %61 = arith.index_cast %arg0 : i32 to index
    %c4 = arith.constant 4 : index
    %62 = memref.load %arg1[%61, %c4] : memref<2x9xf32, #tpu.memory_space<smem>>
    %63 = vector.broadcast %62 : f32 to vector<32x128xf32>
    %64 = arith.mulf %63, %0 : vector<32x128xf32>
    %65 = arith.addf %60, %64 : vector<32x128xf32>
    %66 = arith.index_cast %arg0 : i32 to index
    %c5 = arith.constant 5 : index
    %67 = memref.load %arg1[%66, %c5] : memref<2x9xf32, #tpu.memory_space<smem>>
    %cst_13 = arith.constant 0.000000e+00 : f32
    %68 = vector.broadcast %cst_13 : f32 to vector<32x1xf32>
    %69 = vector.extract_strided_slice %0 {offsets = [0, 1], sizes = [32, 127], strides = [1, 1]} : vector<32x128xf32> to vector<32x127xf32>
    %70 = tpu.concatenate %69, %68 in 1 : vector<32x127xf32>, vector<32x1xf32> -> vector<32x128xf32>
    %cst_14 = arith.constant 0.000000e+00 : f32
    %71 = vector.broadcast %cst_14 : f32 to vector<32x128xf32>
    %72 = arith.select %19, %70, %71 : vector<32x128xi1>, vector<32x128xf32>
    %73 = vector.broadcast %67 : f32 to vector<32x128xf32>
    %74 = arith.mulf %73, %72 : vector<32x128xf32>
    %75 = arith.addf %65, %74 : vector<32x128xf32>
    %cst_15 = arith.constant 0.000000e+00 : f32
    %76 = vector.broadcast %cst_15 : f32 to vector<1x128xf32>
    %77 = vector.extract_strided_slice %0 {offsets = [1, 0], sizes = [31, 128], strides = [1, 1]} : vector<32x128xf32> to vector<31x128xf32>
    %78 = tpu.concatenate %77, %76 in 0 : vector<31x128xf32>, vector<1x128xf32> -> vector<32x128xf32>
    %79 = arith.index_cast %arg0 : i32 to index
    %c6 = arith.constant 6 : index
    %80 = memref.load %arg1[%79, %c6] : memref<2x9xf32, #tpu.memory_space<smem>>
    %cst_16 = arith.constant 0.000000e+00 : f32
    %81 = vector.broadcast %cst_16 : f32 to vector<32x1xf32>
    %82 = vector.extract_strided_slice %78 {offsets = [0, 0], sizes = [32, 127], strides = [1, 1]} : vector<32x128xf32> to vector<32x127xf32>
    %83 = tpu.concatenate %81, %82 in 1 : vector<32x1xf32>, vector<32x127xf32> -> vector<32x128xf32>
    %cst_17 = arith.constant 0.000000e+00 : f32
    %84 = vector.broadcast %cst_17 : f32 to vector<32x128xf32>
    %85 = arith.select %21, %83, %84 : vector<32x128xi1>, vector<32x128xf32>
    %86 = vector.broadcast %80 : f32 to vector<32x128xf32>
    %87 = arith.mulf %86, %85 : vector<32x128xf32>
    %88 = arith.addf %75, %87 : vector<32x128xf32>
    %89 = arith.index_cast %arg0 : i32 to index
    %c7 = arith.constant 7 : index
    %90 = memref.load %arg1[%89, %c7] : memref<2x9xf32, #tpu.memory_space<smem>>
    %91 = vector.broadcast %90 : f32 to vector<32x128xf32>
    %92 = arith.mulf %91, %78 : vector<32x128xf32>
    %93 = arith.addf %88, %92 : vector<32x128xf32>
    %94 = arith.index_cast %arg0 : i32 to index
    %c8 = arith.constant 8 : index
    %95 = memref.load %arg1[%94, %c8] : memref<2x9xf32, #tpu.memory_space<smem>>
    %cst_18 = arith.constant 0.000000e+00 : f32
    %96 = vector.broadcast %cst_18 : f32 to vector<32x1xf32>
    %97 = vector.extract_strided_slice %78 {offsets = [0, 1], sizes = [32, 127], strides = [1, 1]} : vector<32x128xf32> to vector<32x127xf32>
    %98 = tpu.concatenate %97, %96 in 1 : vector<32x127xf32>, vector<32x1xf32> -> vector<32x128xf32>
    %cst_19 = arith.constant 0.000000e+00 : f32
    %99 = vector.broadcast %cst_19 : f32 to vector<32x128xf32>
    %100 = arith.select %19, %98, %99 : vector<32x128xi1>, vector<32x128xf32>
    %101 = vector.broadcast %95 : f32 to vector<32x128xf32>
    %102 = arith.mulf %101, %100 : vector<32x128xf32>
    %103 = arith.addf %93, %102 : vector<32x128xf32>
    %104 = vector.shape_cast %103 : vector<32x128xf32> to vector<1x32x128xf32>
    %cst_20 = arith.constant dense<0xFF800000> : vector<1xf32>
    %105 = vector.multi_reduction <maximumf>, %104, %cst_20 [1, 2] : vector<1x32x128xf32> to vector<1xf32>
    %106 = vector.shape_cast %105 : vector<1xf32> to vector<1x1x1xf32>
    %107 = vector.extract %106[0, 0, 0] : f32 from vector<1x1x1xf32>
    %108 = vector.broadcast %107 : f32 to vector<1x1xf32>
    %cst_21 = arith.constant 7.812500e-03 : f32
    %109 = vector.broadcast %cst_21 : f32 to vector<1x1xf32>
    %110 = arith.mulf %108, %109 : vector<1x1xf32>
    %cst_22 = arith.constant 0.000000e+00 : f32
    %111 = vector.broadcast %cst_22 : f32 to vector<1x1xf32>
    %112 = arith.cmpf ogt, %110, %111 : vector<1x1xf32>
    %cst_23 = arith.constant 1.000000e+00 : f32
    %113 = vector.broadcast %cst_23 : f32 to vector<1x1xf32>
    %114 = arith.select %112, %110, %113 : vector<1x1xi1>, vector<1x1xf32>
    %115 = math.log %114 : vector<1x1xf32>
    %cst_24 = arith.constant 1.44269502 : f32
    %116 = vector.broadcast %cst_24 : f32 to vector<1x1xf32>
    %117 = arith.mulf %115, %116 : vector<1x1xf32>
    %118 = math.roundeven %117 : vector<1x1xf32>
    %cst_25 = arith.constant 0.000000e+00 : f32
    %119 = vector.broadcast %cst_25 : f32 to vector<1x1xf32>
    %120 = arith.subf %119, %118 : vector<1x1xf32>
    %cst_26 = arith.constant 0.693147182 : f32
    %121 = vector.broadcast %cst_26 : f32 to vector<1x1xf32>
    %122 = arith.mulf %120, %121 : vector<1x1xf32>
    %123 = math.exp %122 : vector<1x1xf32>
    %cst_27 = arith.constant 1.000000e+00 : f32
    %124 = vector.broadcast %cst_27 : f32 to vector<1x1xf32>
    %125 = arith.select %112, %123, %124 : vector<1x1xi1>, vector<1x1xf32>
    %126 = vector.broadcast %125 : vector<1x1xf32> to vector<32x128xf32>
    %127 = arith.mulf %103, %126 : vector<32x128xf32>
    %128 = arith.addf %0, %127 : vector<32x128xf32>
    %c0_28 = arith.constant 0 : index
    %c0_29 = arith.constant 0 : index
    %c0_30 = arith.constant 0 : index
    %129 = vector.load %arg3[%c0_28, %c0_29, %c0_30] : memref<1x32x128xf32, #tpu.memory_space<vmem>>, vector<1x32x128xf32>
    %130 = vector.shape_cast %129 : vector<1x32x128xf32> to vector<32x128xf32>
    %131 = vector.shape_cast %128 : vector<32x128xf32> to vector<1x32x128xf32>
    tpu.vector_store %arg3[%c0_28, %c0_29, %c0_30], %131 {strides = array<i32>} : memref<1x32x128xf32, #tpu.memory_space<vmem>>, vector<1x32x128xf32>,
    return
  }
  func.func @transform_0(%arg0: i32, %arg1: memref<2x9xf32, #tpu.memory_space<smem>>) -> (i32, i32) {
    %c0_i32 = arith.constant 0 : i32
    %c0_i32_0 = arith.constant 0 : i32
    %c0_i32_1 = arith.constant 0 : i32
    return %c0_i32, %c0_i32_0 : i32, i32
  }
  func.func @transform_1(%arg0: i32, %arg1: memref<2x9xf32, #tpu.memory_space<smem>>) -> (i32, i32, i32) {
    %c0_i32 = arith.constant 0 : i32
    %c0_i32_0 = arith.constant 0 : i32
    %c0_i32_1 = arith.constant 0 : i32
    return %arg0, %c0_i32, %c0_i32_0 : i32, i32, i32
  }
}

</mosaic_0001>

<bundles_post_ra>
// kernel: forward_model_forward.1
= control target key start
LH: loop header
LB: loop body
LE: loop exit
PB: predicated region body
PF: predicated region fallthrough
CT: control target
= control target key end

     0   :  { %s765_s0 = inlined_call_operand.vmem [shape: f32[2,9], index: 0, kind: input, shape index: {}]   ;;  %s766_s1 = inlined_call_operand.vmem [shape: f32[32,128], index: 1, kind: input, shape index: {}]   ;;  %s767_s2 = inlined_call_operand.vmem [shape: f32[2,32,128], index: 2, kind: output, shape index: {}]  }
   0x1   :  { %s7_s11 = sshll.u32 %s765_s0, 4  ;;  %s8_s11 = int_to_ptr.vmem [resolvable:$true] %s7_s11 }
   0x2   :  { %s492_s12 = scalar_lea.vmem %s8_s11, 32  ;;  %p497_p1 = scmp.lt.s32.totalorder %s8_s11, %s8_s11 }
   0x3   :  { %p493_p0 = scmp.ne.s32.totalorder %s8_s11, %s492_s12  ;;  %p498_p2 = scmp.lt.s32.totalorder %s492_s12, %s492_s12 }
   0x5   :  { %p499_p3 = por %p498_p2, %p497_p1 }
   0x7   :  { %p500_p4 = pnand %p499_p3, %p493_p0 }
   0x9   :  { %503 = shalt.err (!%p500_p4)  }
   0xa   :  { %s514_s13 = smov [#allocation3]  }
   0xb   :  { %10 = dma.vmem_to_smem %s8_s11, 32, %s514_s13, [#allocation2] }
   0xc   :  { %508 = dma.done.wait [#allocation2], 32 }
   0xd   :  { %509 = vsyncadd [#allocation2], 4294967264 }
   0xe   :  { %12 = sfence }
   0xf   :  { %s535_s14 = smov 0  }
  0x10 LB: > { %s541_s0 = sadd.s32 4294967295, %s512_s14   ;;  %p460_p5 = scmp.ge.s32.totalorder %s512_s14, 1  ;;  %s512_s14 = sphi %s535_s14, %s18_s14  }
  0x11   : > { %p84_p6 = scmp.lt.s32.totalorder %s512_s14, 3 }
  0x13   : > { %p85_p7 = pnand %p460_p5, %p84_p6 }
  0x14   : > { %s515_s23 = smov (!%p85_p7), 1   ;;  %s516_s24 = smov (!%p85_p7), 127  }
  0x15   : > { %88 = sbr.rel (%p85_p7) target bundleno = 458 (0x1ca), region = 24  ;;  %s622_s25 = sshll.u32 (!%p85_p7), %s541_s0, 7 }
  0x16   : > { %s174_s26 = sadd.s32 (!%p85_p7), 1, %s622_s25  ;;  %s335_s27 = sadd.s32 (!%p85_p7), 7, %s622_s25 }
  0x17   : > { %s175_s28 = sld [smem:[#allocation3 + %s174_s26]] (!%p85_p7)  ;;  %s185_s30 = sadd.s32 (!%p85_p7), 2, %s622_s25 }
  0x18   : > { %s336_s29 = sld [smem:[#allocation3 + %s335_s27]] (!%p85_p7)  ;;  %s248_s4 = sadd.s32 (!%p85_p7), 4, %s622_s25 }
  0x19   : > { %s142_s3 = sld [smem:[#allocation3 + %s622_s25]] (!%p85_p7)  ;;  %s217_s6 = sadd.s32 (!%p85_p7), 3, %s622_s25 }
  0x1a   : > { %v548_v0 = vld [vmem:[%s766_s1 + $0x8] sm:$0xff]  ;;  %v553_v1 = vld [vmem:[%s766_s1 + $0x10] sm:$0xff]  ;;  %vm128_vm0 = vcmask 1040384   ;;  %v558_v2 = vld [vmem:[%s766_s1] sm:$0xff]  ;;  %vm290_vm1 = vcmask 1046528   ;;  %v108_v22 = vlaneseq  ;;  %s186_s5 = sld [smem:[#allocation3 + %s185_s30]] }
  0x1b   : > { %v130_v3 = vrot.slane %v548_v0, 7  ;;  %v132_v4 = vrot.slane %v553_v1, 7  ;;  %v129_v5 = vrot.slane %v558_v2, 7  ;;  %v566_v6 = vld [vmem:[%s766_s1 + $0x18] sm:$0xff]  ;;  %v292_v12 = vrot.slane %v548_v0, 1  ;;  %s249_s7 = sld [smem:[#allocation3 + %s248_s4]] }
  0x1c   : > { %v134_v7 = vrot.slane %v566_v6, 7  ;;  %v294_v13 = vrot.slane %v553_v1, 1  ;;  %v291_v14 = vrot.slane %v558_v2, 1  ;;  %v296_v17 = vrot.slane %v566_v6, 1  ;;  %s636_s8 = sld [smem:[#allocation3 + %s217_s6]]  ;;  %s259_s9 = sadd.s32 5, %s622_s25 }
  0x1d   : > { %v569_v8 = vsel %vm128_vm0, %v130_v3, %v132_v4  ;;  %v571_v9 = vsel %vm128_vm0, 0.0, %v129_v5  ;;  %v579_v11 = vsel %vm128_vm0, %v129_v5, %v130_v3  ;;  %v109_v25 = vand.u32 127, %v108_v22  ;;  %s664_s10 = sld [smem:[#allocation3 + %s259_s9]]  ;;  %s303_s11 = sadd.s32 6, %s622_s25 }
  0x1e   : > { %148 = vrot.lane.b32.xlu1 %v569_v8, %s515_s23  ;;  %144 = vrot.lane.b32.xlu0 %v571_v9, %s515_s23  ;;  %v577_v10 = vsel %vm128_vm0, %v132_v4, %v134_v7  ;;  %v295_v15 = vsel %vm290_vm1, %v292_v12, %v294_v13  ;;  %v604_v16 = vsel %vm290_vm1, %v291_v14, %v292_v12  ;;  %v610_v18 = vsel %vm290_vm1, %v296_v17, 0.0  ;;  %s690_s12 = sld [smem:[#allocation3 + %s303_s11]]  ;;  %s346_s13 = sadd.s32 8, %s622_s25 }
  0x1f   : > { %v612_v19 = vsel %vm290_vm1, %v294_v13, %v296_v17  ;;  %v114_v28 = vand.u32 31, %v109_v25  ;;  %vm156_vm2 = vcmask 7168   ;;  %v176_v29 = vstv %s175_s28  ;;  %s719_s15 = sld [smem:[#allocation3 + %s346_s13]]  ;;  %p99_p8 = scmp.lt.s32.totalorder %s541_s0, 1 }
  0x20   : > { %v638_v35 = vstv %s336_s29  ;;  %vm199_vm5 = vcmask 1039360   ;;  %v179_v37 = vmul.f32 %v176_v29, %v569_v8  ;;  %v177_v38 = vmul.f32 %v176_v29, %v571_v9 }
  0x21   : > { %vm630_vm3 = vcmp.ge.s32.totalorder %v114_v28, 1  ;;  %vm640_vm4 = vcmp.lt.s32.totalorder %v114_v28, 31  ;;  %v180_v39 = vmul.f32 %v176_v29, %v577_v10  ;;  %v165_v40 = vstv %s142_s3  ;;  %s773_s0 = smov (!%p99_p8, %s541_s0), 1 }
  0x22   : > { %150 = vrot.lane.b32.xlu1 %v577_v10, %s515_s23  ;;  %146 = vrot.lane.b32.xlu0 %v579_v11, %s515_s23  ;;  %v178_v47 = vmul.f32 %v176_v29, %v579_v11  ;;  %v656_v48 = vmul.f32 %v638_v35, %v295_v15  ;;  %v208_v51 = vstv %s186_s5  ;;  %v662_v54 = vstv %s249_s7  ;;  %s466_s17 = sshll.u32 %s773_s0, 5 }
  0x23   : > { %v239_v4 = vstv %s636_s8  ;;  %s103_s20 = scalar_lea.vmem %s767_s2, %s466_s17 }
  0x26   : > { %189 = vrot.lane.b32.xlu1 %v579_v11, %s516_s24  ;;  %187 = vrot.lane.b32.xlu0 %v571_v9, %s516_s24 }
  0x2a   : > { %193 = vrot.lane.b32.xlu1 %v577_v10, %s516_s24  ;;  %191 = vrot.lane.b32.xlu0 %v569_v8, %s516_s24  ;;  %v252_v8 = vmul.f32 %v662_v54, %v548_v0 }
  0x2e   : > { %221 = vrot.lane.b32.xlu1 %v548_v0, %s515_s23  ;;  %219 = vrot.lane.b32.xlu0 %v558_v2, %s515_s23 }
  0x32   : > { %225 = vrot.lane.b32.xlu1 %v566_v6, %s515_s23  ;;  %223 = vrot.lane.b32.xlu0 %v553_v1, %s515_s23 }
  0x36   : > { %263 = vrot.lane.b32.xlu1 %v548_v0, %s516_s24  ;;  %261 = vrot.lane.b32.xlu0 %v558_v2, %s516_s24 }
  0x3a   : > { %267 = vrot.lane.b32.xlu1 %v566_v6, %s516_s24  ;;  %265 = vrot.lane.b32.xlu0 %v553_v1, %s516_s24 }
  0x3e   : > { %308 = vrot.lane.b32.xlu1 %v295_v15, %s515_s23  ;;  %306 = vrot.lane.b32.xlu0 %v604_v16, %s515_s23 }
  0x42   : > { %312 = vrot.lane.b32.xlu1 %v610_v18, %s515_s23  ;;  %310 = vrot.lane.b32.xlu0 %v612_v19, %s515_s23 }
  0x46   : > { %350 = vrot.lane.b32.xlu1 %v295_v15, %s516_s24  ;;  %348 = vrot.lane.b32.xlu0 %v604_v16, %s516_s24 }
  0x4a   : > { %354 = vrot.lane.b32.xlu1 %v610_v18, %s516_s24  ;;  %352 = vrot.lane.b32.xlu0 %v612_v19, %s516_s24 }
  0x90   : > { %v149_v20 = vpop.permute.xlu1 %148  ;;  %v145_v21 = vpop.permute.xlu0 %144 }
  0x91   : > { %v157_v33 = vsel %vm156_vm2, 0.0, %v145_v21  ;;  %v159_v41 = vsel %vm156_vm2, 0.0, %v149_v20 }
  0x92   : > { %v161_v42 = vsel %vm630_vm3, %v157_v33, 0.0  ;;  %v163_v55 = vsel %vm630_vm3, %v159_v41, 0.0  ;;  %v281_v33 = vstv %s664_s10 }
  0x93   : > { %v166_v56 = vmul.f32 %v165_v40, %v161_v42  ;;  %v168_v9 = vmul.f32 %v165_v40, %v163_v55 }
  0x94   : > { %v151_v23 = vpop.permute.xlu1 %150  ;;  %v147_v24 = vpop.permute.xlu0 %146 }
  0x95   : > { %v158_v34 = vsel %vm156_vm2, 0.0, %v147_v24  ;;  %v160_v43 = vsel %vm156_vm2, 0.0, %v151_v23  ;;  %v181_v20 = vadd.f32 %v177_v38, %v166_v56  ;;  %v183_v38 = vadd.f32 %v179_v37, %v168_v9 }
  0x96   : > { %v162_v44 = vsel %vm630_vm3, %v158_v34, 0.0  ;;  %v164_v57 = vsel %vm630_vm3, %v160_v43, 0.0  ;;  %v251_v34 = vmul.f32 %v662_v54, %v558_v2  ;;  %v254_v56 = vmul.f32 %v662_v54, %v566_v6 }
  0x97   : > { %v167_v58 = vmul.f32 %v165_v40, %v162_v44  ;;  %v169_v10 = vmul.f32 %v165_v40, %v164_v57 }
  0x98   : > { %v190_v26 = vpop.permute.xlu1 %189  ;;  %v188_v27 = vpop.permute.xlu0 %187 }
  0x99   : > { %v201_v49 = vsel %vm199_vm5, %v190_v26, 0.0  ;;  %v200_v50 = vsel %vm199_vm5, %v188_v27, 0.0  ;;  %v182_v21 = vadd.f32 %v178_v47, %v167_v58  ;;  %v184_v40 = vadd.f32 %v180_v39, %v169_v10 }
  0x9a   : > { %v205_v59 = vsel %vm640_vm4, %v201_v49, 0.0  ;;  %v204_v60 = vsel %vm640_vm4, %v200_v50, 0.0  ;;  %v338_v39 = vmul.f32 %v638_v35, %v604_v16 }
  0x9b   : > { %v210_v13 = vmul.f32 %v208_v51, %v205_v59  ;;  %v209_v14 = vmul.f32 %v208_v51, %v204_v60 }
  0x9c   : > { %v194_v30 = vpop.permute.xlu1 %193  ;;  %v192_v31 = vpop.permute.xlu0 %191 }
  0x9d   : > { %v203_v61 = vsel %vm199_vm5, %v194_v30, 0.0  ;;  %v202_v62 = vsel %vm199_vm5, %v192_v31, 0.0  ;;  %v214_v41 = vadd.f32 %v210_v13, %v182_v21  ;;  %v213_v42 = vadd.f32 %v209_v14, %v181_v20 }
  0x9e   : > { %v207_v15 = vsel %vm640_vm4, %v203_v61, 0.0  ;;  %v206_v17 = vsel %vm640_vm4, %v202_v62, 0.0  ;;  %v340_v21 = vmul.f32 %v638_v35, %v612_v19 }
  0x9f   : > { %v212_v30 = vmul.f32 %v208_v51, %v207_v15  ;;  %v211_v31 = vmul.f32 %v208_v51, %v206_v17 }
  0xa0   : > { %v222_v45 = vpop.permute.xlu1 %221  ;;  %v220_v46 = vpop.permute.xlu0 %219 }
  0xa1   : > { %v232_v52 = vsel %vm156_vm2, 0.0, %v222_v45  ;;  %v231_v53 = vsel %vm156_vm2, 0.0, %v220_v46  ;;  %v215_v55 = vadd.f32 %v211_v31, %v183_v38 }
  0xa2   : > { %v236_v5 = vsel %vm630_vm3, %v232_v52, 0.0  ;;  %v235_v7 = vsel %vm630_vm3, %v231_v53, 0.0  ;;  %v216_v53 = vadd.f32 %v212_v30, %v184_v40  ;;  %v368_v40 = vstv %s719_s15 }
  0xa3   : > { %v241_v22 = vmul.f32 %v239_v4, %v236_v5  ;;  %v240_v23 = vmul.f32 %v239_v4, %v235_v7 }
  0xa4   : > { %v226_v63 = vpop.permute.xlu1 %225  ;;  %v224_v3 = vpop.permute.xlu0 %223 }
  0xa5   : > { %v234_v11 = vsel %vm156_vm2, 0.0, %v226_v63  ;;  %v233_v12 = vsel %vm156_vm2, 0.0, %v224_v3  ;;  %v245_v50 = vadd.f32 %v241_v22, %v214_v41  ;;  %v244_v51 = vadd.f32 %v240_v23, %v213_v42 }
  0xa6   : > { %v238_v26 = vsel %vm630_vm3, %v234_v11, 0.0  ;;  %v237_v27 = vsel %vm630_vm3, %v233_v12, 0.0  ;;  %v253_v63 = vmul.f32 %v662_v54, %v553_v1  ;;  %v326_v3 = vstv %s690_s12 }
  0xa7   : > { %v243_v43 = vmul.f32 %v239_v4, %v238_v26  ;;  %v242_v44 = vmul.f32 %v239_v4, %v237_v27  ;;  %v256_v5 = vadd.f32 %v252_v8, %v245_v50  ;;  %v255_v7 = vadd.f32 %v251_v34, %v244_v51 }
  0xa8   : > { %v264_v24 = vpop.permute.xlu1 %263  ;;  %v262_v25 = vpop.permute.xlu0 %261  ;;  %v341_v8 = vmul.f32 %v638_v35, %v610_v18 }
  0xa9   : > { %v274_v28 = vsel %vm199_vm5, %v264_v24, 0.0  ;;  %v273_v29 = vsel %vm199_vm5, %v262_v25, 0.0  ;;  %v247_v61 = vadd.f32 %v243_v43, %v216_v53  ;;  %v246_v62 = vadd.f32 %v242_v44, %v215_v55 }
  0xaa   : > { %v278_v45 = vsel %vm640_vm4, %v274_v28, 0.0  ;;  %v277_v46 = vsel %vm640_vm4, %v273_v29, 0.0 }
  0xab   : > { %v283_v57 = vmul.f32 %v281_v33, %v278_v45  ;;  %v282_v58 = vmul.f32 %v281_v33, %v277_v46  ;;  %v258_v22 = vadd.f32 %v254_v56, %v247_v61  ;;  %v257_v23 = vadd.f32 %v253_v63, %v246_v62 }
  0xac   : > { %v268_v47 = vpop.permute.xlu1 %267  ;;  %v266_v49 = vpop.permute.xlu0 %265 }
  0xad   : > { %v276_v52 = vsel %vm199_vm5, %v268_v47, 0.0  ;;  %v275_v37 = vsel %vm199_vm5, %v266_v49, 0.0  ;;  %v287_v54 = vadd.f32 %v283_v57, %v256_v5  ;;  %v286_v15 = vadd.f32 %v282_v58, %v255_v7 }
  0xae   : > { %v280_v59 = vsel %vm640_vm4, %v276_v52, 0.0  ;;  %v279_v60 = vsel %vm640_vm4, %v275_v37, 0.0 }
  0xaf   : > { %v285_v11 = vmul.f32 %v281_v33, %v280_v59  ;;  %v284_v12 = vmul.f32 %v281_v33, %v279_v60 }
  0xb0   : > { %v309_v16 = vpop.permute.xlu1 %308  ;;  %v307_v4 = vpop.permute.xlu0 %306 }
  0xb1   : > { %v319_v9 = vsel %vm156_vm2, 0.0, %v309_v16  ;;  %v318_v10 = vsel %vm156_vm2, 0.0, %v307_v4  ;;  %v289_v30 = vadd.f32 %v285_v11, %v258_v22  ;;  %v288_v31 = vadd.f32 %v284_v12, %v257_v23 }
  0xb2   : > { %v323_v13 = vsel %vm630_vm3, %v319_v9, 0.0  ;;  %v322_v14 = vsel %vm630_vm3, %v318_v10, 0.0 }
  0xb3   : > { %v328_v17 = vmul.f32 %v326_v3, %v323_v13  ;;  %v327_v20 = vmul.f32 %v326_v3, %v322_v14 }
  0xb4   : > { %v313_v24 = vpop.permute.xlu1 %312  ;;  %v311_v25 = vpop.permute.xlu0 %310 }
  0xb5   : > { %v332_v26 = vadd.f32 %v328_v17, %v287_v54  ;;  %v331_v27 = vadd.f32 %v327_v20, %v286_v15  ;;  %v321_v28 = vsel %vm156_vm2, 0.0, %v313_v24  ;;  %v320_v29 = vsel %vm156_vm2, 0.0, %v311_v25 }
  0xb6   : > { %v325_v33 = vsel %vm630_vm3, %v321_v28, 0.0  ;;  %v324_v18 = vsel %vm630_vm3, %v320_v29, 0.0 }
  0xb7   : > { %v330_v19 = vmul.f32 %v326_v3, %v325_v33  ;;  %v329_v35 = vmul.f32 %v326_v3, %v324_v18  ;;  %v343_v34 = vadd.f32 %v656_v48, %v332_v26  ;;  %v342_v38 = vadd.f32 %v338_v39, %v331_v27 }
  0xb8   : > { %v351_v41 = vpop.permute.xlu1 %350  ;;  %v349_v42 = vpop.permute.xlu0 %348 }
  0xb9   : > { %v334_v43 = vadd.f32 %v330_v19, %v289_v30  ;;  %v333_v44 = vadd.f32 %v329_v35, %v288_v31  ;;  %v361_v45 = vsel %vm199_vm5, %v351_v41, 0.0  ;;  %v360_v46 = vsel %vm199_vm5, %v349_v42, 0.0 }
  0xba   : > { %v365_v47 = vsel %vm640_vm4, %v361_v45, 0.0  ;;  %v364_v32 = vsel %vm640_vm4, %v360_v46, 0.0 }
  0xbb   : > { %v370_v49 = vmul.f32 %v368_v40, %v365_v47  ;;  %v369_v50 = vmul.f32 %v368_v40, %v364_v32  ;;  %v345_v51 = vadd.f32 %v341_v8, %v334_v43  ;;  %v344_v48 = vadd.f32 %v340_v21, %v333_v44 }
  0xbc   : > { %v355_v52 = vpop.permute.xlu1 %354  ;;  %v353_v37 = vpop.permute.xlu0 %352 }
  0xbd   : > { %v363_v39 = vsel %vm199_vm5, %v355_v52, 0.0  ;;  %v362_v53 = vsel %vm199_vm5, %v353_v37, 0.0  ;;  %v374_v57 = vadd.f32 %v370_v49, %v343_v34  ;;  %v373_v58 = vadd.f32 %v369_v50, %v342_v38 }
  0xbe   : > { %v367_v55 = vsel %vm640_vm4, %v363_v39, 0.0  ;;  %v366_v56 = vsel %vm640_vm4, %v362_v53, 0.0 }
  0xbf   : > { %v372_v59 = vmul.f32 %v368_v40, %v367_v55  ;;  %v371_v60 = vmul.f32 %v368_v40, %v366_v56  ;;  %v377_v63 = vmax.f32 %v373_v58, %v374_v57 }
  0xc1   : > { %v376_v61 = vadd.f32 %v372_v59, %v345_v51  ;;  %v375_v62 = vadd.f32 %v371_v60, %v344_v48 }
  0xc3   : > { %v378_v3 = vmax.f32 %v375_v62, %v376_v61 }
  0xc5   : > { %v379_v16 = vmax.f32 %v377_v63, %v378_v3 }
  0xc7   : > { %380 = vmax.xlane.f32.xlu0 %v379_v16 }
 0x150   : > { %v381_v4 = vpop.xlane.xlu0 %380 }
 0x151   : > { %v382_v5 = vrot.slane %v381_v4, 4 }
 0x153   : > { %v383_v7 = vmax.f32 %v381_v4, %v382_v5 }
 0x155   : > { %v384_v9 = vrot.slane %v383_v7, 2 }
 0x157   : > { %v385_v10 = vmax.f32 %v383_v7, %v384_v9 }
 0x159   : > { %v386_v11 = vrot.slane %v385_v10, 1 }
 0x15b   : > { %v387_v12 = vmax.f32 %v385_v10, %v386_v11 }
 0x15d   : > { %467 = vpush %v387_v12 }
 0x18e   : > { %s468_s16 = spop %467 }
 0x18f   : > { %v389_v36 = vstv %s468_s16 }
 0x190   : > { %v390_v13 = vmul.f32 0.0078125, %v389_v36 }
 0x192   : > { %vm391_vm6 = vcmp.gt.f32.partialorder %v390_v13, 0.0 }
 0x193   : > { %v392_v14 = vsel %vm391_vm6, %v390_v13, 1.0 }
 0x194   : > { %488 = vlog2.f32 %v392_v14 }
 0x1a1   : > { %v489_v54 = vpop.eup %488 }
 0x1a2   : > { %v394_v15 = vmul.f32 0.6931472, %v489_v54 }
 0x1a4   : > { %v395_v17 = vmul.f32 1.442695, %v394_v15 }
 0x1a6   : > { %v471_v20 = vcvt.f32.s32 %v395_v17  ;;  %v469_v21 = vand.u32 2147483647, %v395_v17  ;;  %v474_v23 = vand.u32 2147483648, %v395_v17 }
 0x1a8   : > { %v472_v8 = vcvt.s32.f32 %v471_v20  ;;  %vm470_vm7 = vcmp.lt.f32.partialorder %v469_v21, 8388608.0 }
 0x1aa   : > { %v473_v22 = vand.u32 2147483647, %v472_v8 }
 0x1ac   : > { %v475_v24 = vor.u32 %v474_v23, %v473_v22 }
 0x1ae   : > { %v476_v25 = vsel %vm470_vm7, %v475_v24, %v395_v17 }
 0x1af   : > { %v397_v26 = vsub.f32 0.0, %v476_v25 }
 0x1b1   : > { %v398_v27 = vmul.f32 0.6931472, %v397_v26 }
 0x1b3   : > { %v399_v28 = vmul.f32 1.442695, %v398_v27 }
 0x1b5   : > { %490 = vpow2.f32 %v399_v28 }
 0x1c2   : > { %v491_v29 = vpop.eup %490 }
 0x1c3   : > { %v401_v30 = vsel %vm391_vm6, %v491_v29, 1.0 }
 0x1c4   : > { %v402_v31 = vmul.f32 %v401_v30, %v373_v58  ;;  %v403_v33 = vmul.f32 %v401_v30, %v374_v57  ;;  %v404_v18 = vmul.f32 %v401_v30, %v375_v62  ;;  %v405_v19 = vmul.f32 %v401_v30, %v376_v61 }
 0x1c6   : > { %v406_v35 = vadd.f32 %v402_v31, %v558_v2  ;;  %v407_v34 = vadd.f32 %v403_v33, %v548_v0  ;;  %v408_v38 = vadd.f32 %v404_v18, %v553_v1  ;;  %v409_v40 = vadd.f32 %v405_v19, %v566_v6 }
 0x1c8   : > { %410 = vst [vmem:[%s103_s20] sm:$0xff] %v406_v35  ;;  %411 = vst [vmem:[%s103_s20 + $0x8] sm:$0xff] %v407_v34 }
 0x1c9   : > { %412 = vst [vmem:[%s103_s20 + $0x10] sm:$0xff] %v408_v38  ;;  %413 = vst [vmem:[%s103_s20 + $0x18] sm:$0xff] %v409_v40 }
 0x1ca PF: > { %s18_s14 = sadd.s32 1, %s512_s14  }
 0x1cb   : > { %p15_p9 = scmp.ge.s32.totalorder %s18_s14, 4  }
 0x1cd   :  { %17 = sbr.rel (!%p15_p9) target bundleno = 16 (0x10), region = 51 }

</bundles_post_ra>
